<compile_context>
chip_gen: v7x
topology: tpu7x:2x2x1
jax: 0.10.0
libtpu: 0.0.40
codegen_flags: <defaults>
</compile_context>

<pallas_src>
import functools

import jax
import jax.numpy as jnp
from jax.experimental import pallas as pl
from jax.experimental.pallas import tpu as pltpu

LANE = 128


def _round_up(n, m):
    return ((n + m - 1) // m) * m


def sage_layer_kernel(a_ref, xfull_ref, wcat_ref, b_ref, o_ref, *, act, valid_cols):
    """One SAGEConv layer for a row-tile of nodes.

    a_ref:     [TM, Np]      bf16 row-tile of the mean-normalized adjacency (pipelined)
    xfull_ref: [Np, Fin]     bf16 full node features (resident)
    wcat_ref:  [2*Fin, Fout] bf16 = concat([W_l, W_r], axis=0)
    b_ref:     [1, Fout]     f32 bias
    o_ref:     [TM, Fout]    output row-tile
    """
    tm = a_ref.shape[0]
    row0 = pl.multiple_of(pl.program_id(0) * tm, tm)

    # Mean aggregation over in-neighbors: big MXU matmul, f32 accumulation.
    agg = jnp.dot(a_ref[...], xfull_ref[...], preferred_element_type=jnp.float32)

    # Fused projection: [agg | x_root] @ [W_l ; W_r]  (doubles contraction dim K).
    x_root = xfull_ref[pl.ds(row0, tm), :]
    cat = jnp.concatenate([agg.astype(jnp.bfloat16), x_root], axis=1)
    z = jnp.dot(cat, wcat_ref[...], preferred_element_type=jnp.float32) + b_ref[...]

    if act == "relu":
        o_ref[...] = jnp.maximum(z, 0.0).astype(o_ref.dtype)
    else:  # log_softmax over the first `valid_cols` (real-class) columns; padding masked out
        col = jax.lax.broadcasted_iota(jnp.int32, z.shape, 1)
        z = jnp.where(col < valid_cols, z, -1e30)
        m = jnp.max(z, axis=1, keepdims=True)
        s = z - m
        lse = jnp.log(jnp.sum(jnp.exp(s), axis=1, keepdims=True))
        o_ref[...] = (s - lse).astype(o_ref.dtype)


def _sage_layer(a_bf16, x_bf16, w_cat, b, *, act, valid_cols, out_dtype, tm):
    np_, fin = x_bf16.shape
    fout = w_cat.shape[1]
    grid = (np_ // tm,)

    kernel = functools.partial(sage_layer_kernel, act=act, valid_cols=valid_cols)

    flops = 2 * np_ * np_ * fin + 2 * np_ * (2 * fin) * fout
    bytes_accessed = (a_bf16.size * 2 + x_bf16.size * 2 + w_cat.size * 2
                      + b.size * 4 + np_ * fout * jnp.dtype(out_dtype).itemsize)
    transcendentals = np_ * fout if act == "log_softmax" else 0

    return pl.pallas_call(
        kernel,
        out_shape=jax.ShapeDtypeStruct((np_, fout), out_dtype),
        grid=grid,
        in_specs=[
            pl.BlockSpec((tm, np_), lambda i: (i, 0)),        # A row-tile: pipelined HBM stream
            pl.BlockSpec((np_, fin), lambda i: (0, 0)),       # full features, resident
            pl.BlockSpec((2 * fin, fout), lambda i: (0, 0)),  # fused [W_l ; W_r]
            pl.BlockSpec((1, fout), lambda i: (0, 0)),        # bias
        ],
        out_specs=pl.BlockSpec((tm, fout), lambda i: (i, 0)),
        compiler_params=pltpu.CompilerParams(
            dimension_semantics=("parallel",),        # shard row-tiles over v7x's 2 TCs
            vmem_limit_bytes=48 * 1024 * 1024,        # fits v7x 64 MiB physical VMEM w/ headroom
        ),
        cost_estimate=pl.CostEstimate(
            flops=flops, transcendentals=transcendentals, bytes_accessed=bytes_accessed),
    )(a_bf16, x_bf16, w_cat, b)


def graphsage_net(a_mean, x, params, *, tm=128):
    """Full GraphSAGE_Net forward (eval mode) as two row-tiled Pallas TPU kernels."""
    w1l, w1r, b1, w2l, w2r, b2 = params
    n, f = x.shape
    h_dim = w1l.shape[1]
    c = w2l.shape[1]

    np_ = _round_up(n, max(tm, LANE))
    fp = _round_up(f, LANE)
    hp = _round_up(h_dim, LANE)
    cp = _round_up(c, LANE)

    def pad2(m, rows, cols):
        return jnp.pad(m, ((0, rows - m.shape[0]), (0, cols - m.shape[1])))

    # bf16 inputs (f32 accumulation inside the kernel), zero-padded to lane-dense shapes.
    a_p = pad2(a_mean, np_, np_).astype(jnp.bfloat16)
    x_p = pad2(x, np_, fp).astype(jnp.bfloat16)

    w1_cat = jnp.concatenate([pad2(w1l, fp, hp), pad2(w1r, fp, hp)], axis=0).astype(jnp.bfloat16)
    b1_p = pad2(b1, 1, hp).astype(jnp.float32)
    w2_cat = jnp.concatenate([pad2(w2l, hp, cp), pad2(w2r, hp, cp)], axis=0).astype(jnp.bfloat16)
    b2_p = pad2(b2, 1, cp).astype(jnp.float32)

    # Layer 1: SAGEConv -> ReLU (intermediate kept bf16 to halve layer-2 HBM traffic).
    h = _sage_layer(a_p, x_p, w1_cat, b1_p, act="relu", valid_cols=hp,
                    out_dtype=jnp.bfloat16, tm=tm)

    # F.dropout(x, training=self.training): identity in eval mode.
    # TODO(synk): training-mode dropout (pltpu.prng_seed + prng_random_bits mask) not implemented.

    # Layer 2: SAGEConv -> log_softmax over the real C classes (padded columns masked).
    z = _sage_layer(a_p, h, w2_cat, b2_p, act="log_softmax", valid_cols=c,
                    out_dtype=jnp.float32, tm=tm)
    return z[:n, :c]


def graphsage_net_ref(a_mean, x, params):
    """Plain-JAX f32 reference of the same forward, for correctness checking."""
    w1l, w1r, b1, w2l, w2r, b2 = params
    h = jnp.maximum(a_mean @ x @ w1l + x @ w1r + b1, 0.0)
    z = a_mean @ h @ w2l + h @ w2r + b2
    return jax.nn.log_softmax(z, axis=1)


def build_mean_adjacency(edge_index, num_nodes):
    """Dense row-normalized adjacency for PyG-style mean aggregation.

    edge_index: [2, E] with edge_index[0]=source(j), edge_index[1]=target(i).
    Nodes with no in-edges get an all-zero row (matching PyG scatter-mean semantics).
    """
    src, dst = edge_index[0], edge_index[1]
    a = jnp.zeros((num_nodes, num_nodes), jnp.float32)
    a = a.at[dst, src].set(1.0)
    deg = jnp.sum(a, axis=1, keepdims=True)
    return a / jnp.maximum(deg, 1.0)


def init_params(key, features, hidden, classes):
    """Glorot-uniform-ish init mirroring SAGEConv's lin_l / lin_r / bias."""
    ks = jax.random.split(key, 4)

    def glorot(k, fan_in, fan_out):
        lim = jnp.sqrt(6.0 / (fan_in + fan_out))
        return jax.random.uniform(k, (fan_in, fan_out), jnp.float32, -lim, lim)

    w1l = glorot(ks[0], features, hidden)   # sage1.lin_l.weight^T (aggregated-neighbor path)
    w1r = glorot(ks[1], features, hidden)   # sage1.lin_r.weight^T (root path)
    b1 = jnp.zeros((1, hidden), jnp.float32)
    w2l = glorot(ks[2], hidden, classes)
    w2r = glorot(ks[3], hidden, classes)
    b2 = jnp.zeros((1, classes), jnp.float32)
    return (w1l, w1r, b1, w2l, w2r, b2)


if __name__ == "__main__":
    # Small synthetic Cora-like graph; sizes deliberately non-aligned to exercise the
    # padding path (N->256 rows = 2 grid tiles of 128, F/H/C padded to 128 lanes).
    N, FEATURES, HIDDEN, CLASSES, E = 200, 48, 32, 7, 1000

    key = jax.random.PRNGKey(0)
    kx, ke, kp = jax.random.split(key, 3)

    x = jax.random.normal(kx, (N, FEATURES), jnp.float32)
    edge_index = jax.random.randint(ke, (2, E), 0, N, jnp.int32)
    a_mean = build_mean_adjacency(edge_index, N)
    params = init_params(kp, FEATURES, HIDDEN, CLASSES)

    out = jax.block_until_ready(graphsage_net(a_mean, x, params))

    assert out.shape == (N, CLASSES)
    # Rows of log_softmax exponentiate to probability distributions.
    row_sums = jnp.exp(out).sum(axis=1)
    assert bool(jnp.all(jnp.abs(row_sums - 1.0) < 1e-4))
    # Matches a plain-JAX f32 reference within bf16 tolerance.
    ref = graphsage_net_ref(a_mean, x, params)
    max_err = float(jnp.max(jnp.abs(out - ref)))
    assert max_err < 0.1, max_err
    print("KERNEL_OK")
</pallas_src>

<mosaic_0001>
module attributes {stable_mosaic.version = 11 : i64} {
  func.func @sage_layer_kernel(%arg0: i32, %arg1: memref<128x256xbf16, #tpu.memory_space<vmem>>, %arg2: memref<256x128xbf16, #tpu.memory_space<vmem>>, %arg3: memref<256x128xbf16, #tpu.memory_space<vmem>>, %arg4: memref<1x128xf32, #tpu.memory_space<vmem>>, %arg5: memref<128x128xbf16, #tpu.memory_space<vmem>>) attributes {dimension_semantics = [#tpu.dimension_semantics<parallel>], iteration_bounds = array<i64: 2>, scalar_prefetch = 0 : i64, scratch_operands = 0 : i64, tpu.core_type = #tpu.core_type<tc>, window_params = [{transform_indices = @transform_0, window_bounds = array<i64: 128, 256>}, {pipeline_mode = #tpu.pipeline_mode<synchronous>, transform_indices = @transform_1, window_bounds = array<i64: 256, 128>}, {pipeline_mode = #tpu.pipeline_mode<synchronous>, transform_indices = @transform_2, window_bounds = array<i64: 256, 128>}, {pipeline_mode = #tpu.pipeline_mode<synchronous>, transform_indices = @transform_3, window_bounds = array<i64: 1, 128>}, {transform_indices = @transform_4, window_bounds = array<i64: 128, 128>}]} {
    %c128_i32 = arith.constant 128 : i32
    %0 = arith.muli %arg0, %c128_i32 : i32
    %1 = tpu.assume_multiple %0, 128 : i32
    %c0 = arith.constant 0 : index
    %c0_0 = arith.constant 0 : index
    %2 = vector.load %arg1[%c0, %c0_0] : memref<128x256xbf16, #tpu.memory_space<vmem>>, vector<128x256xbf16>
    %c0_1 = arith.constant 0 : index
    %c0_2 = arith.constant 0 : index
    %3 = vector.load %arg2[%c0_1, %c0_2] : memref<256x128xbf16, #tpu.memory_space<vmem>>, vector<256x128xbf16>
    %cst = arith.constant dense<0.000000e+00> : vector<128x128xf32>
    %4 = tpu.matmul %2, %3, %cst {dimension_numbers = #tpu.dot_dimension_numbers<[1], [0], [0], [1], [0, 0, 1, 1], [], []>} : vector<128x256xbf16>, vector<256x128xbf16>, vector<128x128xf32> -> vector<128x128xf32>
    %5 = arith.index_cast %1 : i32 to index
    %c0_3 = arith.constant 0 : index
    %6 = vector.load %arg2[%5, %c0_3] : memref<256x128xbf16, #tpu.memory_space<vmem>>, vector<128x128xbf16>
    %7 = arith.truncf %4 : vector<128x128xf32> to vector<128x128xbf16>
    %8 = tpu.concatenate %7, %6 in 1 : vector<128x128xbf16>, vector<128x128xbf16> -> vector<128x256xbf16>
    %c0_4 = arith.constant 0 : index
    %c0_5 = arith.constant 0 : index
    %9 = vector.load %arg3[%c0_4, %c0_5] : memref<256x128xbf16, #tpu.memory_space<vmem>>, vector<256x128xbf16>
    %cst_6 = arith.constant dense<0.000000e+00> : vector<128x128xf32>
    %10 = tpu.matmul %8, %9, %cst_6 {dimension_numbers = #tpu.dot_dimension_numbers<[1], [0], [0], [1], [0, 0, 1, 1], [], []>} : vector<128x256xbf16>, vector<256x128xbf16>, vector<128x128xf32> -> vector<128x128xf32>
    %c0_7 = arith.constant 0 : index
    %c0_8 = arith.constant 0 : index
    %11 = vector.load %arg4[%c0_7, %c0_8] : memref<1x128xf32, #tpu.memory_space<vmem>>, vector<1x128xf32>
    %12 = vector.broadcast %11 : vector<1x128xf32> to vector<128x128xf32>
    %13 = arith.addf %10, %12 : vector<128x128xf32>
    %cst_9 = arith.constant 0.000000e+00 : f32
    %14 = vector.broadcast %cst_9 : f32 to vector<128x128xf32>
    %15 = arith.maximumf %13, %14 : vector<128x128xf32>
    %16 = arith.truncf %15 : vector<128x128xf32> to vector<128x128xbf16>
    %c0_10 = arith.constant 0 : index
    %c0_11 = arith.constant 0 : index
    %17 = vector.load %arg5[%c0_10, %c0_11] : memref<128x128xbf16, #tpu.memory_space<vmem>>, vector<128x128xbf16>
    tpu.vector_store %arg5[%c0_10, %c0_11], %16 {strides = array<i32>} : memref<128x128xbf16, #tpu.memory_space<vmem>>, vector<128x128xbf16>,
    return
  }
  func.func @transform_0(%arg0: i32) -> (i32, i32) {
    %c0_i32 = arith.constant 0 : i32
    %c0_i32_0 = arith.constant 0 : i32
    return %arg0, %c0_i32 : i32, i32
  }
  func.func @transform_1(%arg0: i32) -> (i32, i32) {
    %c0_i32 = arith.constant 0 : i32
    %c0_i32_0 = arith.constant 0 : i32
    %c0_i32_1 = arith.constant 0 : i32
    return %c0_i32, %c0_i32_0 : i32, i32
  }
  func.func @transform_2(%arg0: i32) -> (i32, i32) {
    %c0_i32 = arith.constant 0 : i32
    %c0_i32_0 = arith.constant 0 : i32
    %c0_i32_1 = arith.constant 0 : i32
    return %c0_i32, %c0_i32_0 : i32, i32
  }
  func.func @transform_3(%arg0: i32) -> (i32, i32) {
    %c0_i32 = arith.constant 0 : i32
    %c0_i32_0 = arith.constant 0 : i32
    %c0_i32_1 = arith.constant 0 : i32
    return %c0_i32, %c0_i32_0 : i32, i32
  }
  func.func @transform_4(%arg0: i32) -> (i32, i32) {
    %c0_i32 = arith.constant 0 : i32
    %c0_i32_0 = arith.constant 0 : i32
    return %arg0, %c0_i32 : i32, i32
  }
}

</mosaic_0001>

<bundles_post_ra>
// kernel: tpu_custom_call.1
= control target key start
LH: loop header
LB: loop body
LE: loop exit
PB: predicated region body
PF: predicated region fallthrough
CT: control target
= control target key end

     0   :  { %9 = vsyncpa [#allocation3], 0  ;;  %s1997_s0 = inlined_call_operand.hbm [shape: bf16[256,256], index: 0, kind: input, shape index: {}]   ;;  %s1998_s1 = inlined_call_operand.hbm [shape: bf16[256,128], index: 1, kind: input, shape index: {}]   ;;  %s1999_s2 = inlined_call_operand.hbm [shape: bf16[256,128], index: 2, kind: input, shape index: {}]   ;;  %s2000_s3 = inlined_call_operand.vmem [shape: f32[1,128], index: 3, kind: input, shape index: {}]   ;;  %s2001_s4 = inlined_call_operand.hbm [shape: bf16[256,128], index: 4, kind: output, shape index: {}]  }
   0x1   :  { %11 = vsyncpa [#allocation3 + $0x1], 0 }
   0x2   :  { %12 = vsyncpa [#allocation6], 0 }
   0x3   :  { %13 = vsyncpa [#allocation4], 0 }
   0x4   :  { %15 = vsyncpa [#allocation4 + $0x1], 0  ;;  %s1701_s15 = smov 0   ;;  %s1703_s16 = smov 0  }
   0x5   :  { %s1705_s17 = smov 0   ;;  %s1707_s18 = smov 0  }
   0x6 LB: > { %s1722_s19 = sadd.s32 4294967295, %s1664_s18   ;;  %s1083_s20 = sadd.s32 4294967294, %s1664_s18   ;;  %s1664_s18 = sphi %s1707_s18, %s2021_s18   ;;  %s1660_s17 = sphi %s1705_s17, %s2020_s17   ;;  %s1656_s16 = sphi %s1703_s16, %s2019_s16   ;;  %s1652_s15 = sphi %s1701_s15, %s2018_s15  }
   0x7   : > { %p41_p0 = scmp.ne.s32.totalorder %s1656_s16, %s1652_s15  ;;  %p2002_p1 = scmp.eq.s32.totalorder %s1722_s19, 0 }
   0x8   : > { %p134_p3 = scmp.eq.s32.totalorder %s1083_s20, 1  ;;  %p1084_p5 = scmp.ge.s32.totalorder %s1664_s18, 1 }
   0x9   : > { %p1731_p4 = por %p2002_p1, %p41_p0  ;;  %p141_p7 = scmp.lt.s32.totalorder %s1664_s18, 3 }
   0xa   : > { %p1736_p6 = por %p134_p3, %p41_p0  ;;  %s1666_s24 = smov [#allocation5]  }
   0xb   : > { %s2005_s21 = scalar_select %p1731_p4, 1, 0 }
   0xc   : > { %s2006_s22 = scalar_select %p1736_p6, 1, 0 }
   0xd   : > { %p1741_p8 = pnand %p1084_p5, %p141_p7  ;;  %s153_s25 = sshll.u32 %s1666_s24, 4  ;;  %s1745_s25 = int_to_ptr.vmem [resolvable:$true] %s153_s25 }
   0xe   : > { %s1667_s27 = smov [#allocation7]   ;;  %s1508_s5 = scalar_lea.hbm %s1998_s1, 2048 }
   0xf   : > { %p1383_p9 = pneg %p1741_p8  ;;  %s166_s28 = sshll.u32 %s1667_s27, 4  ;;  %s1756_s28 = int_to_ptr.vmem [resolvable:$true] %s166_s28 }
  0x10   : > { %p1509_p12 = scmp.ne.s32.totalorder %s1998_s1, %s1508_s5  ;;  %p1515_p5 = scmp.lt.u32.totalorder %s1508_s5, %s1998_s1 }
  0x11   : > { %p1752_p11 = pnand %p1383_p9, %p2002_p1 }
  0x13   : > { %p1510_p13 = pneg %p1752_p11 }
  0x15   : > { %p1511_p0 = pnand %p1510_p13, %p1509_p12 }
  0x17   : > { %p1512_p3 = pneg %p1511_p0 }
  0x19   : > { %p1517_p7 = pnand %p1515_p5, %p1512_p3 }
  0x1b   : > { %1520 = shalt.err (!%p1517_p7)
}
  0x1c   : > { %s1521_s10 = scalar_lea.vmem %s1745_s25, 2048  ;;  %p1529_p2 = scmp.lt.s32.totalorder %s1745_s25, %s1745_s25 }
  0x1d   : > { %p1522_p9 = scmp.ne.s32.totalorder %s1745_s25, %s1521_s10  ;;  %p1530_p12 = scmp.lt.s32.totalorder %s1521_s10, %s1521_s10 }
  0x1f   : > { %p1524_p10 = pnand %p1522_p9, %p1510_p13  ;;  %p1531_p0 = por %p1530_p12, %p1529_p2 }
  0x21   : > { %p1525_p1 = pneg %p1524_p10 }
  0x23   : > { %p1532_p6 = pnand %p1531_p0, %p1525_p1 }
  0x25   : > { %1535 = shalt.err (!%p1532_p6)
}
  0x26   : > { %s1668_s11 = smov 64   ;;  %s1669_s12 = smov 4  }
  0x27   : > { %1386 = dma.hbm_to_vmem [thread:$0]  (!%p1752_p11), %s1998_s1, 2048, %s1745_s25, [#allocation6], %s1668_s11, %s1668_s11, %s1669_s12  }
  0x28   : > { %s1536_s27 = scalar_lea.hbm %s1999_s2, 2048 }
  0x29   : > { %p1537_p2 = scmp.ne.s32.totalorder %s1999_s2, %s1536_s27  ;;  %p1543_p10 = scmp.lt.u32.totalorder %s1536_s27, %s1999_s2 }
  0x2b   : > { %p1539_p1 = pnand %p1537_p2, %p1510_p13 }
  0x2d   : > { %p1540_p6 = pneg %p1539_p1 }
  0x2f   : > { %p1545_p3 = pnand %p1543_p10, %p1540_p6 }
  0x31   : > { %1548 = shalt.err (!%p1545_p3)
}
  0x32   : > { %s1549_s25 = scalar_lea.vmem %s1756_s28, 2048  ;;  %p1557_p12 = scmp.lt.s32.totalorder %s1756_s28, %s1756_s28 }
  0x33   : > { %p1550_p5 = scmp.ne.s32.totalorder %s1756_s28, %s1549_s25  ;;  %p1558_p0 = scmp.lt.s32.totalorder %s1549_s25, %s1549_s25 }
  0x35   : > { %p1552_p7 = pnand %p1550_p5, %p1510_p13  ;;  %p1559_p2 = por %p1558_p0, %p1557_p12 }
  0x37   : > { %p1553_p9 = pneg %p1552_p7 }
  0x39   : > { %p1560_p1 = pnand %p1559_p2, %p1553_p9 }
  0x3b   : > { %1563 = shalt.err (!%p1560_p1)
}
  0x3c   : > { %1389 = dma.hbm_to_vmem [thread:$0]  (!%p1752_p11), %s1999_s2, 2048, %s1756_s28, [#allocation6], %s1668_s11, %s1668_s11, %s1669_s12  }
  0x3d   : > { %s1811_s9 = sadd.s32 1, %s1664_s18   ;;  %s28_s26 = sadd.s32 1, %s1660_s17 }
  0x3e   : > { %s25_s10 = ssub.s32 %s1664_s18, %s1811_s9  ;;  %p35_p13 = scmp.ne.s32.totalorder %s1660_s17, %s1656_s16 }
  0x3f   : > { %p26_p6 = scmp.eq.s32.totalorder %s25_s10, 0  ;;  %p36_p10 = scmp.eq.s32.totalorder %s1664_s18, 0 }
  0x40   : > { %p2009_p3 = scmp.eq.s32.totalorder %s1722_s19, 1  ;;  %p1400_p7 = scmp.lt.s32.totalorder %s1664_s18, 2 }
  0x41   : > { %s1827_s14 = scalar_select %p26_p6, %s1660_s17, %s28_s26  }
  0x42   : > { %p1821_p5 = por %p2009_p3, %p35_p13  ;;  %p37_p9 = por %p36_p10, %p35_p13 }
  0x43   : > { %s183_s20 = sand.u32 1, %s1660_s17   ;;  %s1178_s28 = sshll.u32 %s1664_s18, 11 }
  0x44   : > { %s2010_s13 = scalar_select %p1821_p5, 1, 0 }
  0x45   : > { %s1088_s24 = sshll.u32 %s183_s20, 7  ;;  %s1834_s27 = scalar_lea.hbm %s1997_s0, %s1178_s28 }
  0x46   : > { %s187_s29 = scalar_lea.vmem [#allocation2], %s1088_s24  ;;  %p1838_p11 = pnand %p1400_p7, %p37_p9 }
  0x47   : > { %s195_s30 = sshll.u32 %s187_s29, 4  ;;  %s1842_s6 = scalar_lea.sflag [#allocation3], %s183_s20  ;;  %s1836_s30 = int_to_ptr.vmem [resolvable:$true] %s195_s30 }
  0x48   : > { %s1564_s25 = scalar_lea.hbm %s1834_s27, 2048  ;;  %p1566_p0 = pneg %p1838_p11 }
  0x49   : > { %p1565_p12 = scmp.ne.s32.totalorder %s1834_s27, %s1564_s25  ;;  %s1569_s26 = scalar_lea.hbm %s1997_s0, 4096 }
  0x4a   : > { %p1570_p13 = scmp.lt.u32.totalorder %s1834_s27, %s1997_s0  ;;  %p1571_p6 = scmp.lt.u32.totalorder %s1569_s26, %s1564_s25 }
  0x4b   : > { %p1567_p2 = pnand %p1566_p0, %p1565_p12  ;;  %p1573_p3 = scmp.lt.u32.totalorder %s1564_s25, %s1834_s27 }
  0x4c   : > { %p1572_p10 = por %p1571_p6, %p1570_p13 }
  0x4d   : > { %p1568_p1 = pneg %p1567_p2 }
  0x4e   : > { %p1574_p7 = por %p1573_p3, %p1572_p10 }
  0x50   : > { %p1575_p9 = pnand %p1574_p7, %p1568_p1 }
  0x52   : > { %1578 = shalt.err (!%p1575_p9)
}
  0x53   : > { %s1579_s20 = scalar_lea.vmem %s1836_s30, 2048  ;;  %s1670_s28 = smov [#allocation2]  }
  0x54   : > { %p1580_p12 = scmp.ne.s32.totalorder %s1836_s30, %s1579_s20  ;;  %s1584_s11 = sshll.u32 %s1670_s28, 4  ;;  %s1585_s11 = int_to_ptr.vmem [resolvable:$false] %s1584_s11 }
  0x55   : > { %s1586_s12 = scalar_lea.vmem %s1585_s11, 4096  ;;  %p1587_p4 = scmp.lt.s32.totalorder %s1836_s30, %s1585_s11 }
  0x56   : > { %p1582_p2 = pnand %p1580_p12, %p1566_p0  ;;  %p1588_p13 = scmp.lt.s32.totalorder %s1586_s12, %s1579_s20 }
  0x58   : > { %p1583_p5 = pneg %p1582_p2  ;;  %p1589_p6 = por %p1588_p13, %p1587_p4 }
  0x5a   : > { %p1590_p10 = pnand %p1589_p6, %p1583_p5 }
  0x5c   : > { %1593 = shalt.err (!%p1590_p10)
}
  0x5d   : > { %s1671_s29 = smov 128   ;;  %s1672_s25 = smov 8  }
  0x5e   : > { %1393 = dma.hbm_to_vmem [thread:$0]  (!%p1838_p11), %s1834_s27, 2048, %s1836_s30, %s1842_s6, %s1671_s29, %s1671_s29, %s1672_s25  }
  0x5f   : > { %207 = sbr.rel (%p1741_p8) target bundleno = 652 (0x28c), region = 36  ;;  %s1873_s7 = sand.u32 (!%p1741_p8), 1, %s1656_s16  }
  0x60   : > { %s1093_s8 = sshll.u32 (!%p1741_p8), %s1873_s7, 7  ;;  %s210_s26 = scalar_lea.sflag (!%p1741_p8), [#allocation3], %s1873_s7 }
  0x61   : > { %s1877_s10 = scalar_lea.vmem (!%p1741_p8), [#allocation2], %s1093_s8  ;;  %p2012_p4 = scmp.ne.s32.totalorder (!%p1741_p8), %s2005_s21, 0 }
  0x66   : > { %1639 = dma.done.wait (%p2012_p4), %s210_s26, 2048  }
  0x67   : > { %1641 = vsyncadd (%p2012_p4), %s210_s26, 4294965248  ;;  %p2013_p5 = scmp.eq.s32.totalorder %s1722_s19, 0 }
  0x69   : > { %1643 = dma.done.wait (%p2013_p5), [#allocation6], 4096   ;;  %p2014_p8 = pmov %p2013_p5 }
  0x6a   : > { %v1444_v0 = vld [vmem:[#allocation5 + $0x40] sm:$0xff]   ;;  %v1446_v2 = vld [vmem:[#allocation5 + $0x48] sm:$0xff]   ;;  %v1448_v4 = vld [vmem:[#allocation5 + $0x50] sm:$0xff]   ;;  %s1097_s21 = sshll.u32 %s1722_s19, 7  ;;  %s1096_s24 = sshll.u32 %s1873_s7, 6 }
  0x6b   : > { %1645 = vsyncadd (%p2014_p8), [#allocation6], 4294963200  ;;  %v1445_v1 = vld [vmem:[#allocation5] sm:$0xff]   ;;  %1243 = vmatprep.subr.bf16.mxu0 %v1444_v0  ;;  %v1447_v3 = vld [vmem:[#allocation5 + $0x8] sm:$0xff]   ;;  %s571_s23 = sshra.s32 %s1097_s21, 3  ;;  %s1922_s20 = scalar_lea.vmem [#allocation8], %s1096_s24 }
  0x6c   : > { %1244 = vmatpush3.bf16.msra.mxu0 %v1445_v1  ;;  %v1449_v5 = vld [vmem:[#allocation5 + $0x10] sm:$0xff]   ;;  %v1450_v6 = vld [vmem:[#allocation5 + $0x58] sm:$0xff]   ;;  %v1452_v8 = vld [vmem:[#allocation5 + $0x60] sm:$0xff]   ;;  %s1130_s27 = sshll.u32 %s571_s23, 2  ;;  %s1195_s28 = sshll.u32 %s1722_s19, 10 }
  0x6d   : > { %1245 = vmatprep.subr.bf16.mxu0 %v1446_v2  ;;  %v1451_v7 = vld [vmem:[#allocation5 + $0x18] sm:$0xff]   ;;  %v1453_v9 = vld [vmem:[#allocation5 + $0x20] sm:$0xff]   ;;  %v1454_v10 = vld [vmem:[#allocation5 + $0x68] sm:$0xff]   ;;  %s1904_s30 = scalar_lea.vmem [#allocation5], %s1130_s27  ;;  %s989_s11 = sshll.u32 %s1922_s20, 4  ;;  %s1952_s11 = int_to_ptr.vmem [resolvable:$true] %s989_s11 }
  0x6e   : > { %v1462_v11 = vld [vmem:[%s1877_s10 + $0x4] ss:$8 sps:$4 sm:$0xff]   ;;  %v1456_v13 = vld [vmem:[#allocation5 + $0x70] sm:$0xff]   ;;  %v1458_v15 = vld [vmem:[#allocation5 + $0x78] sm:$0xff]   ;;  %s1950_s25 = scalar_lea.hbm %s2001_s4, %s1195_s28  ;;  %s976_s8 = scalar_lea.sflag [#allocation4], %s1873_s7 }
  0x6f   : > { %v1455_v12 = vld [vmem:[#allocation5 + $0x28] sm:$0xff]   ;;  %506 = vmatprep.mubr.bf16.mxu0 %v1462_v11  ;;  %v1457_v14 = vld [vmem:[#allocation5 + $0x30] sm:$0xff]   ;;  %v1459_v16 = vld [vmem:[#allocation5 + $0x38] sm:$0xff]   ;;  %s1594_s26 = scalar_lea.vmem %s1952_s11, 1024  ;;  %p2015_p0 = scmp.ne.s32.totalorder %s2010_s13, 0 }
  0x70   : > { %1246 = vmatpush3.bf16.msra.mxu0 %v1447_v3  ;;  %v1484_v17 = vld [vmem:[#allocation7 + $0x40] sm:$0xff]   ;;  %v1463_v20 = vld [vmem:[%s1877_s10 + $0x14] ss:$8 sps:$4 sm:$0xff]   ;;  %v1486_v21 = vld [vmem:[#allocation7 + $0x48] sm:$0xff]   ;;  %p1595_p11 = scmp.ne.s32.totalorder %s1952_s11, %s1594_s26  ;;  %s1673_s19 = smov [#allocation8]  }
  0x71   : > { %1247 = vmatprep.subr.bf16.mxu0 %v1448_v4  ;;  %v1460_v18 = vld [vmem:[%s1877_s10] ss:$8 sps:$4 sm:$0xff]   ;;  %1307 = vmatprep.subr.bf16.mxu1 %v1484_v17  ;;  %v1488_v23 = vld [vmem:[#allocation7 + $0x50] sm:$0xff]   ;;  %v1490_v25 = vld [vmem:[#allocation7 + $0x58] sm:$0xff]  }
  0x72   : > { %v1485_v19 = vld [vmem:[#allocation7] sm:$0xff]   ;;  %v1487_v22 = vld [vmem:[#allocation7 + $0x8] sm:$0xff]   ;;  %v1489_v24 = vld [vmem:[#allocation7 + $0x10] sm:$0xff]   ;;  %p1596_p1 = pnand %p1595_p11, %p2015_p0 }
  0x73   : > { %1308 = vmatpush3.bf16.msra.mxu1 %v1485_v19  ;;  %v1465_v26 = vld [vmem:[%s1877_s10 + $0x10] ss:$8 sps:$4 sm:$0xff]   ;;  %v1466_v27 = vld [vmem:[%s1877_s10 + $0x24] ss:$8 sps:$4 sm:$0xff]   ;;  %v1468_v32 = vld [vmem:[%s1877_s10 + $0x20] ss:$8 sps:$4 sm:$0xff]  }
  0x74   : > { %1248 = vmatpush3.bf16.msra.mxu0 %v1449_v5  ;;  %1309 = vmatprep.subr.bf16.mxu1 %v1486_v21  ;;  %v1491_v28 = vld [vmem:[#allocation7 + $0x18] sm:$0xff]   ;;  %v1492_v29 = vld [vmem:[#allocation7 + $0x60] sm:$0xff]   ;;  %v1494_v31 = vld [vmem:[#allocation7 + $0x68] sm:$0xff]   ;;  %p1597_p3 = pneg %p1596_p1 }
  0x75   : > { %1249 = vmatprep.subr.bf16.mxu0 %v1450_v6  ;;  %v1493_v30 = vld [vmem:[#allocation7 + $0x20] sm:$0xff]   ;;  %v1495_v33 = vld [vmem:[#allocation7 + $0x28] sm:$0xff]   ;;  %v1469_v34 = vld [vmem:[%s1877_s10 + $0x34] ss:$8 sps:$4 sm:$0xff]  }
  0x76   : > { %v1471_v35 = vld [vmem:[%s1877_s10 + $0x30] ss:$8 sps:$4 sm:$0xff]   ;;  %v1472_v36 = vld [vmem:[%s1877_s10 + $0x44] ss:$8 sps:$4 sm:$0xff]   ;;  %v1474_v37 = vld [vmem:[%s1877_s10 + $0x40] ss:$8 sps:$4 sm:$0xff]  }
  0x77   : > { %1310 = vmatpush3.bf16.msra.mxu1 %v1487_v22  ;;  %v1475_v38 = vld [vmem:[%s1877_s10 + $0x54] ss:$8 sps:$4 sm:$0xff]   ;;  %v1477_v39 = vld [vmem:[%s1877_s10 + $0x50] ss:$8 sps:$4 sm:$0xff]   ;;  %v1478_v40 = vld [vmem:[%s1877_s10 + $0x64] ss:$8 sps:$4 sm:$0xff]  }
  0x78   : > { %1250 = vmatpush3.bf16.msra.mxu0 %v1451_v7  ;;  %1311 = vmatprep.subr.bf16.mxu1 %v1488_v23  ;;  %v1480_v41 = vld [vmem:[%s1877_s10 + $0x60] ss:$8 sps:$4 sm:$0xff]   ;;  %v1481_v42 = vld [vmem:[%s1877_s10 + $0x74] ss:$8 sps:$4 sm:$0xff]   ;;  %v1483_v43 = vld [vmem:[%s1877_s10 + $0x70] ss:$8 sps:$4 sm:$0xff]  }
  0x79   : > { %1251 = vmatprep.subr.bf16.mxu0 %v1452_v8  ;;  %v1496_v44 = vld [vmem:[#allocation7 + $0x70] sm:$0xff]   ;;  %v1498_v46 = vld [vmem:[#allocation7 + $0x78] sm:$0xff]   ;;  %v1500_v48 = vld [vmem:[%s1904_s30] sm:$0xff]   ;;  %s1598_s10 = sshll.u32 %s1673_s19, 4  ;;  %s1599_s10 = int_to_ptr.vmem [resolvable:$false] %s1598_s10 }
  0x7a   : > { %v1497_v45 = vld [vmem:[#allocation7 + $0x30] sm:$0xff]   ;;  %v1499_v47 = vld [vmem:[#allocation7 + $0x38] sm:$0xff]   ;;  %814 = vmatprep.mubr.bf16.mxu1 %v1500_v48  ;;  %v1501_v55 = vld [vmem:[%s1904_s30 + $0x8] sm:$0xff]   ;;  %s1600_s21 = scalar_lea.vmem %s1599_s10, 2048  ;;  %p1601_p7 = scmp.lt.s32.totalorder %s1952_s11, %s1599_s10 }
  0x7b   : > { %1312 = vmatpush3.bf16.msra.mxu1 %v1489_v24  ;;  %v1502_v63 = vld [vmem:[%s1904_s30 + $0x10] sm:$0xff]   ;;  %v1503_v7 = vld [vmem:[%s1904_s30 + $0x18] sm:$0xff]   ;;  %v1505_v23 = vld [vmem:[%s1904_s30 + $0x28] sm:$0xff]   ;;  %p1602_p9 = scmp.lt.s32.totalorder %s1600_s21, %s1594_s26 }
  0x7c   : > { %1252 = vmatpush3.bf16.msra.mxu0 %v1453_v9  ;;  %1313 = vmatprep.subr.bf16.mxu1 %v1490_v25 }
  0x7d   : > { %1253 = vmatprep.subr.bf16.mxu0 %v1454_v10  ;;  %p1603_p12 = por %p1602_p9, %p1601_p7 }
  0x7f   : > { %1314 = vmatpush3.bf16.msra.mxu1 %v1491_v28  ;;  %p1604_p2 = pnand %p1603_p12, %p1597_p3 }
  0x80   : > { %1254 = vmatpush3.bf16.msra.mxu0 %v1455_v12  ;;  %1315 = vmatprep.subr.bf16.mxu1 %v1492_v29 }
  0x81   : > { %1255 = vmatprep.subr.bf16.mxu0 %v1456_v13 }
  0x83   : > { %1316 = vmatpush3.bf16.msra.mxu1 %v1493_v30 }
  0x84   : > { %1256 = vmatpush3.bf16.msra.mxu0 %v1457_v14  ;;  %1317 = vmatprep.subr.bf16.mxu1 %v1494_v31  ;;  %v1506_v31 = vld [vmem:[%s1904_s30 + $0x30] sm:$0xff]  }
  0x85   : > { %1257 = vmatprep.subr.bf16.mxu0 %v1458_v15  ;;  %v1504_v15 = vld [vmem:[%s1904_s30 + $0x20] sm:$0xff]  }
  0x87   : > { %1318 = vmatpush3.bf16.msra.mxu1 %v1495_v33 }
  0x88   : > { %1258 = vmatpush3.bf16.msra.mxu0 %v1459_v16  ;;  %1319 = vmatprep.subr.bf16.mxu1 %v1496_v44 }
  0x8b   : > { %507 = vmatmul.mubr.bf16.vlgmr.msra.gmra.mrb[0].mxu0 %v1460_v18  ;;  %1320 = vmatpush3.bf16.msra.mxu1 %v1497_v45 }
  0x8c   : > { %514 = vmatprep.mubr.bf16.mxu0 %v1463_v20  ;;  %1321 = vmatprep.subr.bf16.mxu1 %v1498_v46 }
  0x8f   : > { %1322 = vmatpush3.bf16.msra.mxu1 %v1499_v47 }
  0x93   : > { %515 = vmatmul.mubr.bf16.gmra.mrb[4].mxu0 %v1465_v26 }
  0x94   : > { %522 = vmatprep.mubr.bf16.mxu0 %v1466_v27 }
  0x9b   : > { %523 = vmatmul.mubr.bf16.gmra.mrb[8].mxu0 %v1468_v32 }
  0x9c   : > { %530 = vmatprep.mubr.bf16.mxu0 %v1469_v34 }
  0xa3   : > { %531 = vmatmul.mubr.bf16.gmra.mrb[12].mxu0 %v1471_v35 }
  0xa4   : > { %538 = vmatprep.mubr.bf16.mxu0 %v1472_v36 }
  0xab   : > { %539 = vmatmul.mubr.bf16.gmra.mrb[16].mxu0 %v1474_v37 }
  0xac   : > { %546 = vmatprep.mubr.bf16.mxu0 %v1475_v38 }
  0xb3   : > { %547 = vmatmul.mubr.bf16.gmra.mrb[20].mxu0 %v1477_v39  ;;  %v1507_v39 = vld [vmem:[%s1904_s30 + $0x38] sm:$0xff]  }
  0xb4   : > { %554 = vmatprep.mubr.bf16.mxu0 %v1478_v40 }
  0xbb   : > { %555 = vmatmul.mubr.bf16.gmra.mrb[24].mxu0 %v1480_v41 }
  0xbc   : > { %562 = vmatprep.mubr.bf16.mxu0 %v1481_v42 }
  0xc3   : > { %563 = vmatmul.mubr.bf16.gmra.mrb[28].mxu0 %v1483_v43 }
 0x15e   : > { %v1259_v49 = vpop.f32.mrb[0].mxu0 }
 0x15f   : > { %v1260_v50 = vpop.f32.mrb[1].mxu0 }
 0x160   : > { %v1261_v51 = vadd.f32 %v1260_v50, %v1259_v49  ;;  %v1262_v52 = vpop.f32.mrb[2].mxu0  ;;  %v1917_v49 = vld [vmem:[%s2000_s3] ss:$0 sm:$0xff] }
 0x161   : > { %v1263_v53 = vpop.f32.mrb[3].mxu0 }
 0x162   : > { %v1264_v54 = vadd.f32 %v1263_v53, %v1262_v52 }
 0x164   : > { %v591_v56 = vpack.c.bf16 %v1264_v54, %v1261_v51 }
 0x166   : > { %v1265_v57 = vpop.f32.mrb[4].mxu0  ;;  %815 = vmatmul.mubr.bf16.vlgmr.msra.gmra.mrb[0].mxu1 %v591_v56 }
 0x167   : > { %v1266_v58 = vpop.f32.mrb[5].mxu0  ;;  %822 = vmatprep.mubr.bf16.mxu1 %v1501_v55 }
 0x168   : > { %v1267_v59 = vadd.f32 %v1266_v58, %v1265_v57  ;;  %v1268_v60 = vpop.f32.mrb[6].mxu0 }
 0x169   : > { %v1269_v61 = vpop.f32.mrb[7].mxu0 }
 0x16a   : > { %v1270_v62 = vadd.f32 %v1269_v61, %v1268_v60 }
 0x16c   : > { %v592_v0 = vpack.c.bf16 %v1270_v62, %v1267_v59 }
 0x16e   : > { %v1271_v1 = vpop.f32.mrb[8].mxu0  ;;  %823 = vmatmul.mubr.bf16.gmra.mrb[4].mxu1 %v592_v0 }
 0x16f   : > { %v1272_v2 = vpop.f32.mrb[9].mxu0  ;;  %830 = vmatprep.mubr.bf16.mxu1 %v1502_v63 }
 0x170   : > { %v1273_v3 = vadd.f32 %v1272_v2, %v1271_v1  ;;  %v1274_v4 = vpop.f32.mrb[10].mxu0 }
 0x171   : > { %v1275_v5 = vpop.f32.mrb[11].mxu0 }
 0x172   : > { %v1276_v6 = vadd.f32 %v1275_v5, %v1274_v4 }
 0x174   : > { %v593_v8 = vpack.c.bf16 %v1276_v6, %v1273_v3 }
 0x176   : > { %v1277_v9 = vpop.f32.mrb[12].mxu0  ;;  %831 = vmatmul.mubr.bf16.gmra.mrb[8].mxu1 %v593_v8 }
 0x177   : > { %v1278_v10 = vpop.f32.mrb[13].mxu0  ;;  %838 = vmatprep.mubr.bf16.mxu1 %v1503_v7 }
 0x178   : > { %v1279_v11 = vadd.f32 %v1278_v10, %v1277_v9  ;;  %v1280_v12 = vpop.f32.mrb[14].mxu0 }
 0x179   : > { %v1281_v13 = vpop.f32.mrb[15].mxu0 }
 0x17a   : > { %v1282_v14 = vadd.f32 %v1281_v13, %v1280_v12 }
 0x17c   : > { %v594_v16 = vpack.c.bf16 %v1282_v14, %v1279_v11 }
 0x17e   : > { %v1283_v17 = vpop.f32.mrb[16].mxu0  ;;  %839 = vmatmul.mubr.bf16.gmra.mrb[12].mxu1 %v594_v16 }
 0x17f   : > { %v1284_v18 = vpop.f32.mrb[17].mxu0  ;;  %846 = vmatprep.mubr.bf16.mxu1 %v1504_v15 }
 0x180   : > { %v1285_v19 = vadd.f32 %v1284_v18, %v1283_v17  ;;  %v1286_v20 = vpop.f32.mrb[18].mxu0 }
 0x181   : > { %v1287_v21 = vpop.f32.mrb[19].mxu0 }
 0x182   : > { %v1288_v22 = vadd.f32 %v1287_v21, %v1286_v20 }
 0x184   : > { %v595_v24 = vpack.c.bf16 %v1288_v22, %v1285_v19 }
 0x186   : > { %v1289_v25 = vpop.f32.mrb[20].mxu0  ;;  %847 = vmatmul.mubr.bf16.gmra.mrb[16].mxu1 %v595_v24 }
 0x187   : > { %v1290_v26 = vpop.f32.mrb[21].mxu0  ;;  %854 = vmatprep.mubr.bf16.mxu1 %v1505_v23 }
 0x188   : > { %v1291_v27 = vadd.f32 %v1290_v26, %v1289_v25  ;;  %v1292_v28 = vpop.f32.mrb[22].mxu0 }
 0x189   : > { %v1293_v29 = vpop.f32.mrb[23].mxu0 }
 0x18a   : > { %v1294_v30 = vadd.f32 %v1293_v29, %v1292_v28 }
 0x18c   : > { %v596_v32 = vpack.c.bf16 %v1294_v30, %v1291_v27 }
 0x18e   : > { %v1295_v33 = vpop.f32.mrb[24].mxu0  ;;  %855 = vmatmul.mubr.bf16.gmra.mrb[20].mxu1 %v596_v32 }
 0x18f   : > { %v1296_v34 = vpop.f32.mrb[25].mxu0  ;;  %862 = vmatprep.mubr.bf16.mxu1 %v1506_v31 }
 0x190   : > { %v1297_v35 = vadd.f32 %v1296_v34, %v1295_v33  ;;  %v1298_v36 = vpop.f32.mrb[26].mxu0 }
 0x191   : > { %v1299_v37 = vpop.f32.mrb[27].mxu0 }
 0x192   : > { %v1300_v38 = vadd.f32 %v1299_v37, %v1298_v36 }
 0x194   : > { %v597_v40 = vpack.c.bf16 %v1300_v38, %v1297_v35 }
 0x196   : > { %v1301_v41 = vpop.f32.mrb[28].mxu0  ;;  %863 = vmatmul.mubr.bf16.gmra.mrb[24].mxu1 %v597_v40 }
 0x197   : > { %v1302_v42 = vpop.f32.mrb[29].mxu0  ;;  %870 = vmatprep.mubr.bf16.mxu1 %v1507_v39 }
 0x198   : > { %v1303_v43 = vadd.f32 %v1302_v42, %v1301_v41  ;;  %v1304_v44 = vpop.f32.mrb[30].mxu0 }
 0x199   : > { %v1305_v45 = vpop.f32.mrb[31].mxu0 }
 0x19a   : > { %v1306_v46 = vadd.f32 %v1305_v45, %v1304_v44 }
 0x19c   : > { %v598_v47 = vpack.c.bf16 %v1306_v46, %v1303_v43 }
 0x19e   : > { %871 = vmatmul.mubr.bf16.gmra.mrb[28].mxu1 %v598_v47 }
 0x239   : > { %v1323_v48 = vpop.f32.mrb[0].mxu1 }
 0x23a   : > { %v1324_v50 = vpop.f32.mrb[1].mxu1 }
 0x23b   : > { %v1325_v51 = vadd.f32 %v1324_v50, %v1323_v48  ;;  %v1326_v52 = vpop.f32.mrb[2].mxu1 }
 0x23c   : > { %v1327_v53 = vpop.f32.mrb[3].mxu1 }
 0x23d   : > { %v817_v54 = vadd.f32 %v1325_v51, %v1917_v49  ;;  %v1328_v55 = vadd.f32 %v1327_v53, %v1326_v52 }
 0x23f   : > { %v820_v56 = vadd.f32 %v1328_v55, %v1917_v49  ;;  %v879_v57 = vmax.f32 %v817_v54, 0.0 }
 0x241   : > { %v880_v58 = vmax.f32 %v820_v56, 0.0  ;;  %v1329_v59 = vpop.f32.mrb[4].mxu1 }
 0x242   : > { %v1330_v60 = vpop.f32.mrb[5].mxu1 }
 0x243   : > { %v1199_v61 = vpack.c.bf16 %v880_v58, %v879_v57  ;;  %v1331_v62 = vadd.f32 %v1330_v60, %v1329_v59  ;;  %v1332_v63 = vpop.f32.mrb[6].mxu1 }
 0x244   : > { %v1333_v0 = vpop.f32.mrb[7].mxu1 }
 0x245   : > { %1200 = vst [vmem:[%s1922_s20] sm:$0xff] %v1199_v61   ;;  %v825_v1 = vadd.f32 %v1331_v62, %v1917_v49  ;;  %v1334_v2 = vadd.f32 %v1333_v0, %v1332_v63 }
 0x247   : > { %v828_v3 = vadd.f32 %v1334_v2, %v1917_v49  ;;  %v881_v4 = vmax.f32 %v825_v1, 0.0 }
 0x249   : > { %v882_v5 = vmax.f32 %v828_v3, 0.0  ;;  %v1335_v6 = vpop.f32.mrb[8].mxu1 }
 0x24a   : > { %v1336_v7 = vpop.f32.mrb[9].mxu1 }
 0x24b   : > { %v1204_v8 = vpack.c.bf16 %v882_v5, %v881_v4  ;;  %v1337_v9 = vadd.f32 %v1336_v7, %v1335_v6  ;;  %v1338_v10 = vpop.f32.mrb[10].mxu1 }
 0x24c   : > { %v1339_v11 = vpop.f32.mrb[11].mxu1 }
 0x24d   : > { %1236 = vst [vmem:[%s1922_s20 + $0x8] sm:$0xff] %v1204_v8   ;;  %v833_v12 = vadd.f32 %v1337_v9, %v1917_v49  ;;  %v1340_v13 = vadd.f32 %v1339_v11, %v1338_v10 }
 0x24f   : > { %v836_v14 = vadd.f32 %v1340_v13, %v1917_v49  ;;  %v883_v15 = vmax.f32 %v833_v12, 0.0 }
 0x251   : > { %v884_v16 = vmax.f32 %v836_v14, 0.0  ;;  %v1341_v17 = vpop.f32.mrb[12].mxu1 }
 0x252   : > { %v1342_v18 = vpop.f32.mrb[13].mxu1 }
 0x253   : > { %v1209_v19 = vpack.c.bf16 %v884_v16, %v883_v15  ;;  %v1343_v20 = vadd.f32 %v1342_v18, %v1341_v17  ;;  %v1344_v21 = vpop.f32.mrb[14].mxu1 }
 0x254   : > { %v1345_v22 = vpop.f32.mrb[15].mxu1 }
 0x255   : > { %1237 = vst [vmem:[%s1922_s20 + $0x10] sm:$0xff] %v1209_v19   ;;  %v841_v23 = vadd.f32 %v1343_v20, %v1917_v49  ;;  %v1346_v24 = vadd.f32 %v1345_v22, %v1344_v21 }
 0x257   : > { %v844_v25 = vadd.f32 %v1346_v24, %v1917_v49  ;;  %v885_v26 = vmax.f32 %v841_v23, 0.0 }
 0x259   : > { %v886_v27 = vmax.f32 %v844_v25, 0.0  ;;  %v1347_v28 = vpop.f32.mrb[16].mxu1 }
 0x25a   : > { %v1348_v29 = vpop.f32.mrb[17].mxu1 }
 0x25b   : > { %v1214_v30 = vpack.c.bf16 %v886_v27, %v885_v26  ;;  %v1349_v31 = vadd.f32 %v1348_v29, %v1347_v28  ;;  %v1350_v32 = vpop.f32.mrb[18].mxu1 }
 0x25c   : > { %v1351_v33 = vpop.f32.mrb[19].mxu1 }
 0x25d   : > { %1238 = vst [vmem:[%s1922_s20 + $0x18] sm:$0xff] %v1214_v30   ;;  %v849_v34 = vadd.f32 %v1349_v31, %v1917_v49  ;;  %v1352_v35 = vadd.f32 %v1351_v33, %v1350_v32 }
 0x25f   : > { %v852_v36 = vadd.f32 %v1352_v35, %v1917_v49  ;;  %v887_v37 = vmax.f32 %v849_v34, 0.0 }
 0x261   : > { %v888_v38 = vmax.f32 %v852_v36, 0.0  ;;  %v1353_v39 = vpop.f32.mrb[20].mxu1 }
 0x262   : > { %v1354_v40 = vpop.f32.mrb[21].mxu1 }
 0x263   : > { %v1219_v41 = vpack.c.bf16 %v888_v38, %v887_v37  ;;  %v1355_v42 = vadd.f32 %v1354_v40, %v1353_v39  ;;  %v1356_v43 = vpop.f32.mrb[22].mxu1 }
 0x264   : > { %v1357_v44 = vpop.f32.mrb[23].mxu1 }
 0x265   : > { %1239 = vst [vmem:[%s1922_s20 + $0x20] sm:$0xff] %v1219_v41   ;;  %v857_v45 = vadd.f32 %v1355_v42, %v1917_v49  ;;  %v1358_v46 = vadd.f32 %v1357_v44, %v1356_v43 }
 0x267   : > { %v860_v47 = vadd.f32 %v1358_v46, %v1917_v49  ;;  %v889_v48 = vmax.f32 %v857_v45, 0.0 }
 0x269   : > { %v890_v50 = vmax.f32 %v860_v47, 0.0  ;;  %v1359_v51 = vpop.f32.mrb[24].mxu1 }
 0x26a   : > { %v1360_v52 = vpop.f32.mrb[25].mxu1 }
 0x26b   : > { %v1224_v53 = vpack.c.bf16 %v890_v50, %v889_v48  ;;  %v1361_v54 = vadd.f32 %v1360_v52, %v1359_v51  ;;  %v1362_v55 = vpop.f32.mrb[26].mxu1 }
 0x26c   : > { %v1363_v56 = vpop.f32.mrb[27].mxu1 }
 0x26d   : > { %1240 = vst [vmem:[%s1922_s20 + $0x28] sm:$0xff] %v1224_v53   ;;  %v865_v57 = vadd.f32 %v1361_v54, %v1917_v49  ;;  %v1364_v58 = vadd.f32 %v1363_v56, %v1362_v55 }
 0x26f   : > { %v868_v59 = vadd.f32 %v1364_v58, %v1917_v49  ;;  %v891_v60 = vmax.f32 %v865_v57, 0.0 }
 0x271   : > { %v892_v61 = vmax.f32 %v868_v59, 0.0  ;;  %v1365_v62 = vpop.f32.mrb[28].mxu1 }
 0x272   : > { %v1366_v63 = vpop.f32.mrb[29].mxu1 }
 0x273   : > { %v1229_v0 = vpack.c.bf16 %v892_v61, %v891_v60  ;;  %v1367_v1 = vadd.f32 %v1366_v63, %v1365_v62  ;;  %v1368_v2 = vpop.f32.mrb[30].mxu1 }
 0x274   : > { %v1369_v3 = vpop.f32.mrb[31].mxu1 }
 0x275   : > { %1241 = vst [vmem:[%s1922_s20 + $0x30] sm:$0xff] %v1229_v0   ;;  %v873_v4 = vadd.f32 %v1367_v1, %v1917_v49  ;;  %v1370_v5 = vadd.f32 %v1369_v3, %v1368_v2 }
 0x277   : > { %v876_v6 = vadd.f32 %v1370_v5, %v1917_v49  ;;  %v893_v7 = vmax.f32 %v873_v4, 0.0 }
 0x279   : > { %v894_v8 = vmax.f32 %v876_v6, 0.0 }
 0x27b   : > { %v1234_v9 = vpack.c.bf16 %v894_v8, %v893_v7 }
 0x27d   : > { %1242 = vst [vmem:[%s1922_s20 + $0x38] sm:$0xff] %v1234_v9  }
 0x27e   : > { %1607 = shalt.err (!%p1604_p2)
}
 0x27f   : > { %s1608_s23 = scalar_lea.hbm %s1950_s25, 1024  ;;  %s1612_s5 = scalar_lea.hbm %s2001_s4, 2048 }
 0x280   : > { %p1609_p13 = scmp.ne.s32.totalorder %s1950_s25, %s1608_s23  ;;  %p1613_p4 = scmp.lt.u32.totalorder %s1950_s25, %s2001_s4 }
 0x281   : > { %p1614_p5 = scmp.lt.u32.totalorder %s1612_s5, %s1608_s23  ;;  %p1616_p11 = scmp.lt.u32.totalorder %s1608_s23, %s1950_s25 }
 0x282   : > { %p1610_p6 = pnand %p1609_p13, %p2015_p0 }
 0x283   : > { %p1615_p8 = por %p1614_p5, %p1613_p4 }
 0x284   : > { %p1611_p10 = pneg %p1610_p6 }
 0x285   : > { %p1617_p1 = por %p1616_p11, %p1615_p8 }
 0x287   : > { %p1618_p3 = pnand %p1617_p1, %p1611_p10 }
 0x289   : > { %1621 = shalt.err (!%p1618_p3)
}
 0x28a   : > { %s1674_s20 = smov 64   ;;  %s1675_s28 = smov 4  }
 0x28b   : > { %1381 = dma.vmem_to_hbm [thread:$0]  (%p2015_p0), %s1952_s11, 1024, %s1950_s25, %s976_s8, %s1674_s20, %s1674_s20, %s1675_s28  }
 0x28c PF: > { %s1004_s12 = sand.u32 1, %s1652_s15   ;;  %p2016_p7 = scmp.ne.s32.totalorder %s2006_s22, 0 }
 0x28d   : > { %p2017_p9 = scmp.ge.s32.totalorder %s1664_s18, 2  ;;  %s1005_s29 = scalar_lea.sflag [#allocation4], %s1004_s12 }
 0x28f   : > { %p1395_p12 = pnand %p2017_p9, %p2016_p7 }
 0x291   : > { %1647 = dma.done.wait (!%p1395_p12), %s1005_s29, 1024  }
 0x292   : > { %1649 = vsyncadd (!%p1395_p12), %s1005_s29, 4294966272  ;;  %p18_p2 = scmp.ge.s32.totalorder %s1811_s9, 4   ;;  %s2018_s15 = smov %s1656_s16 }
 0x293   : > { %s2019_s16 = smov %s1660_s17  ;;  %s2020_s17 = smov %s1827_s14 }
 0x294   : > { %s2021_s18 = smov %s1811_s9  ;;  %20 = sbr.rel (!%p18_p2) target bundleno = 6 (0x6), region = 90 }
 0x29b   :  { %1010 = vsyncpa [#allocation3], 1 }
 0x29c   :  { %1012 = vsyncpa [#allocation3 + $0x1], 1 }
 0x29d   :  { %1013 = vsyncpa [#allocation6], 1 }
 0x29e   :  { %1014 = vsyncpa [#allocation4], 1 }
 0x29f   :  { %1016 = vsyncpa [#allocation4 + $0x1], 1 }

</bundles_post_ra>
